<compile_context>
chip_gen: v6e
topology: v6e:2x2x1
jax: 0.10.0
libtpu: 0.0.40
codegen_flags: <defaults>
</compile_context>

<pallas_src>
import math

import jax
import jax.numpy as jnp
from jax import lax
from jax.experimental import pallas as pl
from jax.experimental.pallas import tpu as pltpu


def _feat_score_kernel(xq_ref, xk_ref, adjt_ref, wq_ref, wk_ref, wv_ref,
                       out_ref, q_sc, m_sc, l_sc, acc_sc):
    ki = pl.program_id(1)

    # ---- per-q-tile init (once per query tile, reused across key tiles) ----
    @pl.when(ki == 0)
    def _():
        # q = x_q @ (Wq / sqrt(C)); scale folded into the weight in the wrapper.
        q_sc[...] = jnp.dot(
            xq_ref[...], wq_ref[...], preferred_element_type=jnp.float32
        ).astype(jnp.bfloat16)
        m_sc[...] = jnp.full_like(m_sc, -1e30)
        l_sc[...] = jnp.zeros_like(l_sc)
        acc_sc[...] = jnp.zeros_like(acc_sc)

    # ---- key-tile projections ----
    xk = xk_ref[...]                                                    # (tk, C) bf16
    k = jnp.dot(xk, wk_ref[...],
                preferred_element_type=jnp.float32).astype(jnp.bfloat16)  # (tk, C)
    # Value projection is a single column -> broadcast-mul + lane reduce
    # (VPU/XLU) instead of a degenerate 1-column MXU matmul.
    v = jnp.sum(xk.astype(jnp.float32) * wv_ref[...],
                axis=-1, keepdims=True)                                  # (tk, 1) f32

    # ---- logits in transposed layout: rows = keys, cols = queries ----
    # NT contraction; no explicit transpose of either operand.
    s = lax.dot_general(k, q_sc[...],
                        dimension_numbers=(((1,), (1,)), ((), ())),
                        preferred_element_type=jnp.float32)              # (tk, tq) f32

    mask = adjt_ref[...].astype(jnp.float32) > 0.0                       # (tk, tq)
    s = jnp.where(mask, s, -1e30)

    # ---- online softmax over the key (sublane) axis ----
    m_prev = m_sc[...]                                                   # (1, tq)
    m_new = jnp.maximum(m_prev, jnp.max(s, axis=0, keepdims=True))
    alpha = jnp.exp(m_prev - m_new)
    p = jnp.exp(s - m_new)
    # Explicitly zero non-edges so fully isolated nodes end up with score 0
    # instead of a uniform average (the -1e30 trick alone degenerates there).
    p = jnp.where(mask, p, 0.0)

    l_sc[...] = alpha * l_sc[...] + jnp.sum(p, axis=0, keepdims=True)
    acc_sc[...] = alpha * acc_sc[...] + jnp.sum(p * v, axis=0, keepdims=True)
    m_sc[...] = m_new

    # ---- finalize: lane-dense (1, tq) store ----
    @pl.when(ki == pl.num_programs(1) - 1)
    def _():
        l = l_sc[...]
        l_safe = jnp.where(l > 0.0, l, 1.0)
        out_ref[...] = (acc_sc[...] *
                        pl.reciprocal(l_safe, approx=True)).astype(out_ref.dtype)


def feature_score(x, adj, wq, wk, wv, *, tile=128):
    """Pallas implementation of Feature_Score.forward(x, adj) -> (N,)."""
    n, c = x.shape
    n_pad = pl.cdiv(n, tile) * tile
    pad = n_pad - n
    scale = 1.0 / math.sqrt(c)

    # bf16 MXU operands (f32 accumulation inside the kernel).
    x_p = jnp.pad(x, ((0, pad), (0, 0))).astype(jnp.bfloat16)
    # Transposed adjacency (mask[key, query]) as int8: 4x less DMA for the
    # O(N^2) input; padded rows/cols are zero => masked out.
    adj_t = (jnp.pad(adj, ((0, pad), (0, pad))).T > 0).astype(jnp.int8)
    wq_s = (wq * scale).astype(jnp.bfloat16)      # fold 1/sqrt(C) into Wq
    wk_b = wk.astype(jnp.bfloat16)
    wv_r = wv.reshape(1, c).astype(jnp.float32)   # lane-dense value weight row

    grid = (n_pad // tile, n_pad // tile)

    out = pl.pallas_call(
        _feat_score_kernel,
        out_shape=jax.ShapeDtypeStruct((1, n_pad), jnp.float32),
        grid_spec=pltpu.PrefetchScalarGridSpec(
            num_scalar_prefetch=0,
            grid=grid,
            in_specs=[
                pl.BlockSpec((tile, c), lambda qi, ki: (qi, 0)),      # x (query rows)
                pl.BlockSpec((tile, c), lambda qi, ki: (ki, 0)),      # x (key rows)
                pl.BlockSpec((tile, tile), lambda qi, ki: (ki, qi)),  # adj^T block
                pl.BlockSpec((c, c), lambda qi, ki: (0, 0)),          # Wq * 1/sqrt(C)
                pl.BlockSpec((c, c), lambda qi, ki: (0, 0)),          # Wk
                pl.BlockSpec((1, c), lambda qi, ki: (0, 0)),          # Wv row
            ],
            out_specs=pl.BlockSpec((1, tile), lambda qi, ki: (0, qi)),
            scratch_shapes=[
                pltpu.VMEM((tile, c), jnp.bfloat16),   # q tile (reused across k)
                pltpu.VMEM((1, tile), jnp.float32),    # running max
                pltpu.VMEM((1, tile), jnp.float32),    # running denom
                pltpu.VMEM((1, tile), jnp.float32),    # running numerator
            ],
        ),
        compiler_params=pltpu.CompilerParams(
            dimension_semantics=("parallel", "arbitrary"),
        ),
    )(x_p, x_p, adj_t, wq_s, wk_b, wv_r)

    # .squeeze() from the PyTorch module + drop padding (glue, outside kernel).
    return out.reshape(n_pad)[:n]


if __name__ == "__main__":
    N = 16          # number of graph nodes
    C = 32          # in_channels

    key = jax.random.PRNGKey(0)
    kx, ka, kq, kk, kv = jax.random.split(key, 5)

    x = jax.random.normal(kx, (N, C), dtype=jnp.float32)

    # Random symmetric 0/1 adjacency with self-loops.
    a = (jax.random.uniform(ka, (N, N)) > 0.6).astype(jnp.float32)
    adj = jnp.clip(a + a.T + jnp.eye(N, dtype=jnp.float32), 0.0, 1.0)

    # Deterministic (Glorot-ish) parameter init for feat_self_attention(C, 1).
    wq = jax.random.normal(kq, (C, C), dtype=jnp.float32) * (1.0 / math.sqrt(C))
    wk = jax.random.normal(kk, (C, C), dtype=jnp.float32) * (1.0 / math.sqrt(C))
    wv = jax.random.normal(kv, (C, 1), dtype=jnp.float32) * (1.0 / math.sqrt(C))

    score = feature_score(x, adj, wq, wk, wv)
    jax.block_until_ready(score)

    # Pure-JAX f32 reference with identical masked-softmax semantics.
    def ref(x, adj, wq, wk, wv):
        q = (x @ wq) / math.sqrt(C)
        k = x @ wk
        v = (x @ wv)[:, 0]
        s = q @ k.T
        mask = adj > 0
        s = jnp.where(mask, s, -1e30)
        m = jnp.max(s, axis=-1, keepdims=True)
        p = jnp.where(mask, jnp.exp(s - m), 0.0)
        l = jnp.sum(p, axis=-1)
        l = jnp.where(l > 0, l, 1.0)
        return (p @ v) / l

    expected = ref(x, adj, wq, wk, wv)

    assert score.shape == (N,)
    assert bool(jnp.all(jnp.isfinite(score)))
    assert bool(jnp.allclose(score, expected, atol=5e-2, rtol=5e-2))
    print("KERNEL_OK")
</pallas_src>

<mosaic_0001>
module attributes {stable_mosaic.version = 11 : i64} {
  func.func @_feat_score_kernel(%arg0: i32, %arg1: i32, %arg2: memref<128x32xbf16, #tpu.memory_space<vmem>>, %arg3: memref<128x32xbf16, #tpu.memory_space<vmem>>, %arg4: memref<128x128xi8, #tpu.memory_space<vmem>>, %arg5: memref<32x32xbf16, #tpu.memory_space<vmem>>, %arg6: memref<32x32xbf16, #tpu.memory_space<vmem>>, %arg7: memref<1x32xf32, #tpu.memory_space<vmem>>, %arg8: memref<1x128xf32, #tpu.memory_space<vmem>>, %arg9: memref<128x32xbf16, #tpu.memory_space<vmem>>, %arg10: memref<1x128xf32, #tpu.memory_space<vmem>>, %arg11: memref<1x128xf32, #tpu.memory_space<vmem>>, %arg12: memref<1x128xf32, #tpu.memory_space<vmem>>) attributes {dimension_semantics = [#tpu.dimension_semantics<parallel>, #tpu.dimension_semantics<arbitrary>], iteration_bounds = array<i64: 1, 1>, scalar_prefetch = 0 : i64, scratch_operands = 4 : i64, tpu.core_type = #tpu.core_type<tc>, window_params = [{transform_indices = @transform_0, window_bounds = array<i64: 128, 32>}, {transform_indices = @transform_1, window_bounds = array<i64: 128, 32>}, {transform_indices = @transform_2, window_bounds = array<i64: 128, 128>}, {pipeline_mode = #tpu.pipeline_mode<synchronous>, transform_indices = @transform_3, window_bounds = array<i64: 32, 32>}, {pipeline_mode = #tpu.pipeline_mode<synchronous>, transform_indices = @transform_4, window_bounds = array<i64: 32, 32>}, {pipeline_mode = #tpu.pipeline_mode<synchronous>, transform_indices = @transform_5, window_bounds = array<i64: 1, 32>}, {transform_indices = @transform_6, window_bounds = array<i64: 1, 128>}]} {
    %c0_i32 = arith.constant 0 : i32
    %0 = arith.cmpi eq, %arg1, %c0_i32 : i32
    %1 = arith.extui %0 : i1 to i32
    %c0_i32_0 = arith.constant 0 : i32
    %2 = arith.cmpi ne, %1, %c0_i32_0 : i32
    scf.if %2 {
      %c0_32 = arith.constant 0 : index
      %c0_33 = arith.constant 0 : index
      %50 = vector.load %arg2[%c0_32, %c0_33] : memref<128x32xbf16, #tpu.memory_space<vmem>>, vector<128x32xbf16>
      %c0_34 = arith.constant 0 : index
      %c0_35 = arith.constant 0 : index
      %51 = vector.load %arg5[%c0_34, %c0_35] : memref<32x32xbf16, #tpu.memory_space<vmem>>, vector<32x32xbf16>
      %cst_36 = arith.constant dense<0.000000e+00> : vector<128x32xf32>
      %52 = tpu.matmul %50, %51, %cst_36 {dimension_numbers = #tpu.dot_dimension_numbers<[1], [0], [0], [1], [0, 0, 1, 1], [], []>} : vector<128x32xbf16>, vector<32x32xbf16>, vector<128x32xf32> -> vector<128x32xf32>
      %53 = arith.truncf %52 : vector<128x32xf32> to vector<128x32xbf16>
      %c0_37 = arith.constant 0 : index
      %c0_38 = arith.constant 0 : index
      %54 = vector.load %arg9[%c0_37, %c0_38] : memref<128x32xbf16, #tpu.memory_space<vmem>>, vector<128x32xbf16>
      tpu.vector_store %arg9[%c0_37, %c0_38], %53 {strides = array<i32>} : memref<128x32xbf16, #tpu.memory_space<vmem>>, vector<128x32xbf16>,
      %cst_39 = arith.constant -1.000000e+30 : f32
      %55 = vector.broadcast %cst_39 : f32 to vector<1x128xf32>
      %c0_40 = arith.constant 0 : index
      %c0_41 = arith.constant 0 : index
      %56 = vector.load %arg10[%c0_40, %c0_41] : memref<1x128xf32, #tpu.memory_space<vmem>>, vector<1x128xf32>
      tpu.vector_store %arg10[%c0_40, %c0_41], %55 {strides = array<i32>} : memref<1x128xf32, #tpu.memory_space<vmem>>, vector<1x128xf32>,
      %cst_42 = arith.constant 0.000000e+00 : f32
      %57 = vector.broadcast %cst_42 : f32 to vector<1x128xf32>
      %c0_43 = arith.constant 0 : index
      %c0_44 = arith.constant 0 : index
      %58 = vector.load %arg11[%c0_43, %c0_44] : memref<1x128xf32, #tpu.memory_space<vmem>>, vector<1x128xf32>
      tpu.vector_store %arg11[%c0_43, %c0_44], %57 {strides = array<i32>} : memref<1x128xf32, #tpu.memory_space<vmem>>, vector<1x128xf32>,
      %cst_45 = arith.constant 0.000000e+00 : f32
      %59 = vector.broadcast %cst_45 : f32 to vector<1x128xf32>
      %c0_46 = arith.constant 0 : index
      %c0_47 = arith.constant 0 : index
      %60 = vector.load %arg12[%c0_46, %c0_47] : memref<1x128xf32, #tpu.memory_space<vmem>>, vector<1x128xf32>
      tpu.vector_store %arg12[%c0_46, %c0_47], %59 {strides = array<i32>} : memref<1x128xf32, #tpu.memory_space<vmem>>, vector<1x128xf32>,
    } else {
    }
    %c0 = arith.constant 0 : index
    %c0_1 = arith.constant 0 : index
    %3 = vector.load %arg3[%c0, %c0_1] : memref<128x32xbf16, #tpu.memory_space<vmem>>, vector<128x32xbf16>
    %c0_2 = arith.constant 0 : index
    %c0_3 = arith.constant 0 : index
    %4 = vector.load %arg6[%c0_2, %c0_3] : memref<32x32xbf16, #tpu.memory_space<vmem>>, vector<32x32xbf16>
    %cst = arith.constant dense<0.000000e+00> : vector<128x32xf32>
    %5 = tpu.matmul %3, %4, %cst {dimension_numbers = #tpu.dot_dimension_numbers<[1], [0], [0], [1], [0, 0, 1, 1], [], []>} : vector<128x32xbf16>, vector<32x32xbf16>, vector<128x32xf32> -> vector<128x32xf32>
    %6 = arith.truncf %5 : vector<128x32xf32> to vector<128x32xbf16>
    %7 = arith.extf %3 : vector<128x32xbf16> to vector<128x32xf32>
    %c0_4 = arith.constant 0 : index
    %c0_5 = arith.constant 0 : index
    %8 = vector.load %arg7[%c0_4, %c0_5] : memref<1x32xf32, #tpu.memory_space<vmem>>, vector<1x32xf32>
    %9 = vector.broadcast %8 : vector<1x32xf32> to vector<128x32xf32>
    %10 = arith.mulf %7, %9 : vector<128x32xf32>
    %cst_6 = arith.constant dense<0.000000e+00> : vector<128xf32>
    %11 = vector.multi_reduction <add>, %10, %cst_6 [1] : vector<128x32xf32> to vector<128xf32>
    %12 = vector.shape_cast %11 : vector<128xf32> to vector<128x1xf32>
    %c0_7 = arith.constant 0 : index
    %c0_8 = arith.constant 0 : index
    %13 = vector.load %arg9[%c0_7, %c0_8] : memref<128x32xbf16, #tpu.memory_space<vmem>>, vector<128x32xbf16>
    %cst_9 = arith.constant dense<0.000000e+00> : vector<128x128xf32>
    %14 = tpu.matmul %6, %13, %cst_9 {dimension_numbers = #tpu.dot_dimension_numbers<[1], [1], [0], [0], [0, 0, 1, 0], [], []>} : vector<128x32xbf16>, vector<128x32xbf16>, vector<128x128xf32> -> vector<128x128xf32>
    %c0_10 = arith.constant 0 : index
    %c0_11 = arith.constant 0 : index
    %15 = vector.load %arg4[%c0_10, %c0_11] : memref<128x128xi8, #tpu.memory_space<vmem>>, vector<128x128xi8>
    %16 = arith.sitofp %15 : vector<128x128xi8> to vector<128x128xf32>
    %cst_12 = arith.constant 0.000000e+00 : f32
    %17 = vector.broadcast %cst_12 : f32 to vector<128x128xf32>
    %18 = arith.cmpf ogt, %16, %17 : vector<128x128xf32>
    %cst_13 = arith.constant -1.000000e+30 : f32
    %19 = vector.broadcast %cst_13 : f32 to vector<128x128xf32>
    %20 = arith.select %18, %14, %19 : vector<128x128xi1>, vector<128x128xf32>
    %c0_14 = arith.constant 0 : index
    %c0_15 = arith.constant 0 : index
    %21 = vector.load %arg10[%c0_14, %c0_15] : memref<1x128xf32, #tpu.memory_space<vmem>>, vector<1x128xf32>
    %cst_16 = arith.constant dense<0xFF800000> : vector<128xf32>
    %22 = vector.multi_reduction <maximumf>, %20, %cst_16 [0] : vector<128x128xf32> to vector<128xf32>
    %23 = vector.shape_cast %22 : vector<128xf32> to vector<1x128xf32>
    %24 = arith.maximumf %21, %23 : vector<1x128xf32>
    %25 = arith.subf %21, %24 : vector<1x128xf32>
    %26 = math.exp %25 : vector<1x128xf32>
    %27 = vector.broadcast %24 : vector<1x128xf32> to vector<128x128xf32>
    %28 = arith.subf %20, %27 : vector<128x128xf32>
    %29 = math.exp %28 : vector<128x128xf32>
    %cst_17 = arith.constant 0.000000e+00 : f32
    %30 = vector.broadcast %cst_17 : f32 to vector<128x128xf32>
    %31 = arith.select %18, %29, %30 : vector<128x128xi1>, vector<128x128xf32>
    %c0_18 = arith.constant 0 : index
    %c0_19 = arith.constant 0 : index
    %32 = vector.load %arg11[%c0_18, %c0_19] : memref<1x128xf32, #tpu.memory_space<vmem>>, vector<1x128xf32>
    %33 = arith.mulf %26, %32 : vector<1x128xf32>
    %cst_20 = arith.constant dense<0.000000e+00> : vector<128xf32>
    %34 = vector.multi_reduction <add>, %31, %cst_20 [0] : vector<128x128xf32> to vector<128xf32>
    %35 = vector.shape_cast %34 : vector<128xf32> to vector<1x128xf32>
    %36 = arith.addf %33, %35 : vector<1x128xf32>
    %c0_21 = arith.constant 0 : index
    %c0_22 = arith.constant 0 : index
    %37 = vector.load %arg11[%c0_21, %c0_22] : memref<1x128xf32, #tpu.memory_space<vmem>>, vector<1x128xf32>
    tpu.vector_store %arg11[%c0_21, %c0_22], %36 {strides = array<i32>} : memref<1x128xf32, #tpu.memory_space<vmem>>, vector<1x128xf32>,
    %c0_23 = arith.constant 0 : index
    %c0_24 = arith.constant 0 : index
    %38 = vector.load %arg12[%c0_23, %c0_24] : memref<1x128xf32, #tpu.memory_space<vmem>>, vector<1x128xf32>
    %39 = arith.mulf %26, %38 : vector<1x128xf32>
    %40 = vector.broadcast %12 : vector<128x1xf32> to vector<128x128xf32>
    %41 = arith.mulf %31, %40 : vector<128x128xf32>
    %cst_25 = arith.constant dense<0.000000e+00> : vector<128xf32>
    %42 = vector.multi_reduction <add>, %41, %cst_25 [0] : vector<128x128xf32> to vector<128xf32>
    %43 = vector.shape_cast %42 : vector<128xf32> to vector<1x128xf32>
    %44 = arith.addf %39, %43 : vector<1x128xf32>
    %c0_26 = arith.constant 0 : index
    %c0_27 = arith.constant 0 : index
    %45 = vector.load %arg12[%c0_26, %c0_27] : memref<1x128xf32, #tpu.memory_space<vmem>>, vector<1x128xf32>
    tpu.vector_store %arg12[%c0_26, %c0_27], %44 {strides = array<i32>} : memref<1x128xf32, #tpu.memory_space<vmem>>, vector<1x128xf32>,
    %c0_28 = arith.constant 0 : index
    %c0_29 = arith.constant 0 : index
    %46 = vector.load %arg10[%c0_28, %c0_29] : memref<1x128xf32, #tpu.memory_space<vmem>>, vector<1x128xf32>
    tpu.vector_store %arg10[%c0_28, %c0_29], %24 {strides = array<i32>} : memref<1x128xf32, #tpu.memory_space<vmem>>, vector<1x128xf32>,
    %c0_i32_30 = arith.constant 0 : i32
    %47 = arith.cmpi eq, %arg1, %c0_i32_30 : i32
    %48 = arith.extui %47 : i1 to i32
    %c0_i32_31 = arith.constant 0 : i32
    %49 = arith.cmpi ne, %48, %c0_i32_31 : i32
    scf.if %49 {
      %c0_32 = arith.constant 0 : index
      %c0_33 = arith.constant 0 : index
      %50 = vector.load %arg11[%c0_32, %c0_33] : memref<1x128xf32, #tpu.memory_space<vmem>>, vector<1x128xf32>
      %cst_34 = arith.constant 0.000000e+00 : f32
      %51 = vector.broadcast %cst_34 : f32 to vector<1x128xf32>
      %52 = arith.cmpf ogt, %50, %51 : vector<1x128xf32>
      %cst_35 = arith.constant 1.000000e+00 : f32
      %53 = vector.broadcast %cst_35 : f32 to vector<1x128xf32>
      %54 = arith.select %52, %50, %53 : vector<1x128xi1>, vector<1x128xf32>
      %c0_36 = arith.constant 0 : index
      %c0_37 = arith.constant 0 : index
      %55 = vector.load %arg12[%c0_36, %c0_37] : memref<1x128xf32, #tpu.memory_space<vmem>>, vector<1x128xf32>
      %56 = tpu.reciprocal %54 {approx = true} : vector<1x128xf32> -> vector<1x128xf32>
      %57 = arith.mulf %55, %56 : vector<1x128xf32>
      %c0_38 = arith.constant 0 : index
      %c0_39 = arith.constant 0 : index
      %58 = vector.load %arg8[%c0_38, %c0_39] : memref<1x128xf32, #tpu.memory_space<vmem>>, vector<1x128xf32>
      tpu.vector_store %arg8[%c0_38, %c0_39], %57 {strides = array<i32>} : memref<1x128xf32, #tpu.memory_space<vmem>>, vector<1x128xf32>,
    } else {
    }
    return
  }
  func.func @transform_0(%arg0: i32, %arg1: i32) -> (i32, i32) {
    %c0_i32 = arith.constant 0 : i32
    %c0_i32_0 = arith.constant 0 : i32
    return %arg0, %c0_i32 : i32, i32
  }
  func.func @transform_1(%arg0: i32, %arg1: i32) -> (i32, i32) {
    %c0_i32 = arith.constant 0 : i32
    %c0_i32_0 = arith.constant 0 : i32
    return %arg1, %c0_i32 : i32, i32
  }
  func.func @transform_2(%arg0: i32, %arg1: i32) -> (i32, i32) {
    %c0_i32 = arith.constant 0 : i32
    return %arg1, %arg0 : i32, i32
  }
  func.func @transform_3(%arg0: i32, %arg1: i32) -> (i32, i32) {
    %c0_i32 = arith.constant 0 : i32
    %c0_i32_0 = arith.constant 0 : i32
    %c0_i32_1 = arith.constant 0 : i32
    return %c0_i32, %c0_i32_0 : i32, i32
  }
  func.func @transform_4(%arg0: i32, %arg1: i32) -> (i32, i32) {
    %c0_i32 = arith.constant 0 : i32
    %c0_i32_0 = arith.constant 0 : i32
    %c0_i32_1 = arith.constant 0 : i32
    return %c0_i32, %c0_i32_0 : i32, i32
  }
  func.func @transform_5(%arg0: i32, %arg1: i32) -> (i32, i32) {
    %c0_i32 = arith.constant 0 : i32
    %c0_i32_0 = arith.constant 0 : i32
    %c0_i32_1 = arith.constant 0 : i32
    return %c0_i32, %c0_i32_0 : i32, i32
  }
  func.func @transform_6(%arg0: i32, %arg1: i32) -> (i32, i32) {
    %c0_i32 = arith.constant 0 : i32
    %c0_i32_0 = arith.constant 0 : i32
    return %c0_i32, %arg0 : i32, i32
  }
}

</mosaic_0001>

<bundles_post_ra>
// kernel: tpu_custom_call.1
= control target key start
LH: loop header
LB: loop body
LE: loop exit
PB: predicated region body
PF: predicated region fallthrough
CT: control target
= control target key end

     0   :  { %vm101_vm0 = vcmask 261120   ;;  %s1813_s0 = inlined_call_operand.vmem [shape: bf16[128,32], index: 0, kind: input, shape index: {}]   ;;  %s1814_s1 = inlined_call_operand.vmem [shape: bf16[128,32], index: 1, kind: input, shape index: {}]   ;;  %s1815_s2 = inlined_call_operand.vmem [shape: s8[128,128], index: 2, kind: input, shape index: {}]   ;;  %s1816_s3 = inlined_call_operand.vmem [shape: bf16[32,32], index: 3, kind: input, shape index: {}]   ;;  %s1817_s4 = inlined_call_operand.vmem [shape: bf16[32,32], index: 4, kind: input, shape index: {}]   ;;  %s1818_s5 = inlined_call_operand.vmem [shape: f32[1,32], index: 5, kind: input, shape index: {}]   ;;  %s1819_s6 = inlined_call_operand.hbm [shape: f32[1,128], index: 6, kind: output, shape index: {}]  }
   0x1   :  { %v1280_v0 = vld [vmem:[%s1816_s3 + $0x8] sm:$0xff]   ;;  %v1281_v1 = vld [vmem:[%s1816_s3] sm:$0xff]   ;;  %v1284_v4 = vld [vmem:[%s1813_s0 + $0x10] sm:$0xff]  }
   0x2   :  { %1173 = vmatprep.subr.bf16.mxu0 %v1280_v0  ;;  %v1282_v2 = vld [vmem:[%s1813_s0] sm:$0xff]   ;;  %v1283_v3 = vld [vmem:[%s1813_s0 + $0x8] sm:$0xff]   ;;  %v1285_v9 = vld [vmem:[%s1813_s0 + $0x18] sm:$0xff]  }
   0x3   :  { %1174 = vmatpush3.bf16.msra.mxu0 %v1280_v0  ;;  %1177 = vmatprep.mubr.msk.bf16.mxu0 %vm101_vm0, %v1282_v2  ;;  %v1290_v5 = vld [vmem:[%s1817_s4 + $0x8] sm:$0xff]   ;;  %v1291_v6 = vld [vmem:[%s1817_s4] sm:$0xff]   ;;  %v311_v10 = vld [vmem:[%s1814_s1 + $0x10] sm:$0xff]  }
   0x4   :  { %1175 = vmatprep.subr.bf16.mxu0 %v1281_v1  ;;  %1193 = vmatprep.subr.bf16.mxu1 %v1290_v5  ;;  %v307_v7 = vld [vmem:[%s1814_s1] sm:$0xff]   ;;  %v309_v8 = vld [vmem:[%s1814_s1 + $0x8] sm:$0xff]  }
   0x5   :  { %1194 = vmatpush3.bf16.msra.mxu1 %v1290_v5 }
   0x6   :  { %1195 = vmatprep.subr.bf16.mxu1 %v1291_v6 }
   0x7   :  { %1176 = vmatpush3.bf16.msra.mxu0 %v1281_v1 }
   0xa   :  { %1178 = vmatmul.mubr.msk.bf16.vlgmr.msra.gmra.mxu0 %vm101_vm0, %v1283_v3 }
   0xb   :  { %1181 = vmatprep.mubr.msk.bf16.mxu0 %vm101_vm0, %v1284_v4 }
   0xc   :  { %11 = vsyncpa [#allocation7], 0  ;;  %v1286_v11 = vld [vmem:[%s1813_s0 + $0x20] sm:$0xff]   ;;  %1197 = vmatprep.mubr.msk.bf16.mxu1 %vm101_vm0, %v307_v7  ;;  %1196 = vmatpush3.bf16.msra.mxu1 %v1291_v6  ;;  %v313_v12 = vld [vmem:[%s1814_s1 + $0x18] sm:$0xff]   ;;  %v509_v20 = vunpack.c.l.bf16 %v307_v7  ;;  %v510_v21 = vunpack.c.h.bf16 %v307_v7  ;;  %v511_v22 = vunpack.c.l.bf16 %v309_v8  ;;  %v512_v24 = vunpack.c.h.bf16 %v309_v8 }
   0xd   :  { %v1287_v13 = vld [vmem:[%s1813_s0 + $0x28] sm:$0xff]   ;;  %v315_v14 = vld [vmem:[%s1814_s1 + $0x20] sm:$0xff]   ;;  %v1288_v15 = vld [vmem:[%s1813_s0 + $0x30] sm:$0xff]   ;;  %v513_v27 = vunpack.c.l.bf16 %v311_v10  ;;  %v514_v30 = vunpack.c.h.bf16 %v311_v10  ;;  %v515_v35 = vunpack.c.l.bf16 %v313_v12  ;;  %v516_v38 = vunpack.c.h.bf16 %v313_v12 }
   0xe   :  { %v317_v16 = vld [vmem:[%s1814_s1 + $0x28] sm:$0xff]   ;;  %v1289_v17 = vld [vmem:[%s1813_s0 + $0x38] sm:$0xff]   ;;  %v1481_v18 = vld [vmem:[%s1814_s1 + $0x30] sm:$0xff]   ;;  %v517_v41 = vunpack.c.l.bf16 %v315_v14  ;;  %v518_v44 = vunpack.c.h.bf16 %v315_v14  ;;  %vm287_vm1 = vcmask 257024  }
   0xf   :  { %1198 = vmatmul.mubr.msk.bf16.vlgmr.msra.gmra.mxu1 %vm101_vm0, %v309_v8  ;;  %v1490_v19 = vld [vmem:[%s1814_s1 + $0x38] sm:$0xff]   ;;  %v1497_v23 = vld [vmem:[%s1818_s5] ss:$0 sm:$0xff]  ;;  %v519_v47 = vunpack.c.l.bf16 %v317_v16  ;;  %v520_v50 = vunpack.c.h.bf16 %v317_v16  ;;  %v521_v55 = vunpack.c.l.bf16 %v1481_v18  ;;  %v522_v59 = vunpack.c.h.bf16 %v1481_v18 }
  0x10   :  { %1201 = vmatprep.mubr.msk.bf16.mxu1 %vm101_vm0, %v311_v10  ;;  %v532_v25 = vmul.f32 %v1497_v23, %v509_v20  ;;  %v533_v26 = vmul.f32 %v1497_v23, %v510_v21  ;;  %v534_v28 = vmul.f32 %v1497_v23, %v511_v22  ;;  %v535_v29 = vmul.f32 %v1497_v23, %v512_v24 }
  0x11   :  { %v536_v34 = vmul.f32 %v1497_v23, %v513_v27  ;;  %v537_v37 = vmul.f32 %v1497_v23, %v514_v30  ;;  %v538_v40 = vmul.f32 %v1497_v23, %v515_v35  ;;  %v539_v43 = vmul.f32 %v1497_v23, %v516_v38 }
  0x12   :  { %1182 = vmatmul.mubr.msk.bf16.gmra.mxu0 %vm101_vm0, %v1285_v9  ;;  %v548_v31 = vsel %vm101_vm0, %v532_v25, 0.0  ;;  %v554_v32 = vsel %vm101_vm0, %v534_v28, 0.0  ;;  %v551_v33 = vsel %vm101_vm0, %v533_v26, 0.0  ;;  %v557_v36 = vsel %vm101_vm0, %v535_v29, 0.0 }
  0x13   :  { %1185 = vmatprep.mubr.msk.bf16.mxu0 %vm101_vm0, %v1286_v11  ;;  %549 = vadd.xlane.f32.xlu0 %v548_v31  ;;  %v560_v39 = vsel %vm101_vm0, %v536_v34, 0.0  ;;  %v563_v42 = vsel %vm101_vm0, %v537_v37, 0.0  ;;  %v566_v45 = vsel %vm101_vm0, %v538_v40, 0.0  ;;  %v540_v46 = vmul.f32 %v1497_v23, %v517_v41 }
  0x14   :  { %555 = vadd.xlane.f32.xlu1 %v554_v32  ;;  %v569_v48 = vsel %vm101_vm0, %v539_v43, 0.0  ;;  %v541_v49 = vmul.f32 %v1497_v23, %v518_v44  ;;  %v542_v54 = vmul.f32 %v1497_v23, %v519_v47  ;;  %v543_v58 = vmul.f32 %v1497_v23, %v520_v50 }
  0x15   :  { %v572_v53 = vsel %vm101_vm0, %v540_v46, 0.0  ;;  %v544_v0 = vmul.f32 %v1497_v23, %v521_v55  ;;  %v523_v1 = vunpack.c.l.bf16 %v1490_v19  ;;  %v545_v4 = vmul.f32 %v1497_v23, %v522_v59 }
  0x16   :  { %v575_v57 = vsel %vm101_vm0, %v541_v49, 0.0  ;;  %v578_v63 = vsel %vm101_vm0, %v542_v54, 0.0  ;;  %v581_v3 = vsel %vm101_vm0, %v543_v58, 0.0  ;;  %v524_v5 = vunpack.c.h.bf16 %v1490_v19 }
  0x17   :  { %1202 = vmatmul.mubr.msk.bf16.gmra.mxu1 %vm101_vm0, %v313_v12  ;;  %552 = vadd.xlane.f32.xlu0 %v551_v33  ;;  %v584_v9 = vsel %vm101_vm0, %v544_v0, 0.0  ;;  %v546_v10 = vmul.f32 %v1497_v23, %v523_v1 }
  0x18   :  { %1205 = vmatprep.mubr.msk.bf16.mxu1 %vm101_vm0, %v315_v14  ;;  %558 = vadd.xlane.f32.xlu1 %v557_v36  ;;  %v547_v14 = vmul.f32 %v1497_v23, %v524_v5 }
  0x1a   :  { %1186 = vmatmul.mubr.msk.bf16.gmra.mxu0 %vm101_vm0, %v1287_v13  ;;  %v587_v13 = vsel %vm101_vm0, %v545_v4, 0.0  ;;  %v593_v22 = vsel %vm101_vm0, %v547_v14, 0.0  ;;  %v1375_v14 = vmov 0.0  }
  0x1b   :  { %1189 = vmatprep.mubr.msk.bf16.mxu0 %vm101_vm0, %v1288_v15  ;;  %561 = vadd.xlane.f32.xlu0 %v560_v39  ;;  %305 = vst [vmem:[#allocation4] sm:$0x1] %v1375_v14  ;;  %306 = vst [vmem:[#allocation5] sm:$0x1] %v1375_v14 }
  0x1c   :  { %564 = vadd.xlane.f32.xlu1 %v563_v42 }
  0x1f   :  { %1206 = vmatmul.mubr.msk.bf16.gmra.mxu1 %vm101_vm0, %v317_v16  ;;  %567 = vadd.xlane.f32.xlu0 %v566_v45 }
  0x20   :  { %1209 = vmatprep.mubr.msk.bf16.mxu1 %vm101_vm0, %v1481_v18  ;;  %570 = vadd.xlane.f32.xlu1 %v569_v48 }
  0x22   :  { %1190 = vmatmul.mubr.msk.bf16.gmra.mxu0 %vm101_vm0, %v1289_v17 }
  0x23   :  { %573 = vadd.xlane.f32.xlu0 %v572_v53 }
  0x24   :  { %576 = vadd.xlane.f32.xlu1 %v575_v57 }
  0x27   :  { %1210 = vmatmul.mubr.msk.bf16.gmra.mxu1 %vm101_vm0, %v1490_v19  ;;  %579 = vadd.xlane.f32.xlu0 %v578_v63  ;;  %v590_v19 = vsel %vm101_vm0, %v546_v10, 0.0 }
  0x28   :  { %582 = vadd.xlane.f32.xlu1 %v581_v3 }
  0x2b   :  { %585 = vadd.xlane.f32.xlu0 %v584_v9 }
  0x2c   :  { %588 = vadd.xlane.f32.xlu1 %v587_v13 }
  0x2f   :  { %591 = vadd.xlane.f32.xlu0 %v590_v19 }
  0x30   :  { %594 = vadd.xlane.f32.xlu1 %v593_v22 }
  0xca   :  { %v1179_v51 = vpop.f32.mrf.mxu0 }
  0xcb   :  { %v1123_v52 = vpack.c.bf16 %v1179_v51, %v1179_v51 }
  0xcc   :  { %v160_v56 = vpop.f32.mrf.mxu0 }
  0xcd   :  { %290 = vst.msk [vmem:[#allocation2 + $0x8] sm:$0xf] %vm287_vm1, %v1123_v52  ;;  %v1121_v60 = vpack.c.bf16 %v160_v56, %v160_v56 }
  0xce   :  { %v1180_v61 = vpop.f32.mrf.mxu0 }
  0xcf   :  { %288 = vst.msk [vmem:[#allocation2] sm:$0xf] %vm287_vm1, %v1121_v60  ;;  %v1124_v62 = vpack.c.bf16 %v1180_v61, %v1180_v61  ;;  %v1535_v12 = vpop.f32.mrf.mxu1 }
  0xd0   :  { %v163_v2 = vpop.f32.mrf.mxu0 }
  0xd1   :  { %291 = vst.msk [vmem:[#allocation2 + $0xc] sm:$0xf] %vm287_vm1, %v1124_v62  ;;  %v1122_v6 = vpack.c.bf16 %v163_v2, %v163_v2  ;;  %v438_v17 = vpop.f32.mrf.mxu1 }
  0xd2   :  { %v1183_v7 = vpop.f32.mrf.mxu0 }
  0xd3   :  { %289 = vst.msk [vmem:[#allocation2 + $0x4] sm:$0xf] %vm287_vm1, %v1122_v6  ;;  %v1127_v8 = vpack.c.bf16 %v1183_v7, %v1183_v7  ;;  %v1542_v21 = vpop.f32.mrf.mxu1 }
  0xd4   :  { %v176_v11 = vpop.f32.mrf.mxu0  ;;  %v502_v24 = vpack.c.bf16 %v1542_v21, %v1535_v12  ;;  %v1374_v12 = vmov -1e+30  }
  0xd5   :  { %294 = vst.msk [vmem:[#allocation2 + $0x18] sm:$0xf] %vm287_vm1, %v1127_v8  ;;  %v1125_v15 = vpack.c.bf16 %v176_v11, %v176_v11  ;;  %v441_v26 = vpop.f32.mrf.mxu1  ;;  %304 = vst [vmem:[#allocation3] sm:$0x1] %v1374_v12 }
  0xd6   :  { %v1184_v16 = vpop.f32.mrf.mxu0  ;;  %v501_v28 = vpack.c.bf16 %v441_v26, %v438_v17  ;;  %v799_v17 = vld [vmem:[%s1815_s2 + $0x10] sm:$0xff] }
  0xd7   :  { %292 = vst.msk [vmem:[#allocation2 + $0x10] sm:$0xf] %vm287_vm1, %v1125_v15  ;;  %v1128_v18 = vpack.c.bf16 %v1184_v16, %v1184_v16  ;;  %v1549_v30 = vpop.f32.mrf.mxu1  ;;  %v798_v15 = vld [vmem:[%s1815_s2 + $0x8] sm:$0xff]  ;;  %v797_v16 = vld [vmem:[%s1815_s2] sm:$0xff]  ;;  %v809_v22 = vunpack.c.0.s8 %v799_v17 }
  0xd8   :  { %v179_v20 = vpop.f32.mrf.mxu0  ;;  %1229 = vmatprep.mubr.msk.bf16.mxu0 %vm101_vm0, %v501_v28  ;;  %v1306_v3 = vld [vmem:[#allocation2 + $0x8] sm:$0xff]   ;;  %v803_v19 = vunpack.c.2.s8 %v797_v16  ;;  %v801_v21 = vunpack.c.0.s8 %v797_v16  ;;  %v805_v26 = vunpack.c.0.s8 %v798_v15  ;;  %v802_v28 = vunpack.c.1.s8 %v797_v16 }
  0xd9   :  { %295 = vst.msk [vmem:[#allocation2 + $0x1c] sm:$0xf] %vm287_vm1, %v1128_v18  ;;  %v1126_v23 = vpack.c.bf16 %v179_v20, %v179_v20  ;;  %v1553_v33 = vpop.f32.mrf.mxu1  ;;  %v680_v5 = vsel %vm101_vm0, %v1306_v3, 0  ;;  %v807_v18 = vunpack.c.2.s8 %v798_v15  ;;  %v811_v20 = vunpack.c.2.s8 %v799_v17 }
  0xda   :  { %v1187_v25 = vpop.f32.mrf.mxu0  ;;  %v1307_v6 = vld [vmem:[#allocation2] sm:$0xff]  }
  0xdb   :  { %293 = vst.msk [vmem:[#allocation2 + $0x14] sm:$0xf] %vm287_vm1, %v1126_v23  ;;  %v1131_v27 = vpack.c.bf16 %v1187_v25, %v1187_v25  ;;  %v1556_v36 = vpop.f32.mrf.mxu1  ;;  %v677_v9 = vsel %vm101_vm0, %v1307_v6, 0  ;;  %v804_v25 = vunpack.c.3.s8 %v797_v16 }
  0xdc   :  { %v192_v29 = vpop.f32.mrf.mxu0  ;;  %v504_v38 = vpack.c.bf16 %v1556_v36, %v1549_v30  ;;  %v1634_v36 = vcvt.s32.f32 %v811_v20 }
  0xdd   :  { %298 = vst.msk [vmem:[#allocation2 + $0x28] sm:$0xf] %vm287_vm1, %v1131_v27  ;;  %v1129_v31 = vpack.c.bf16 %v192_v29, %v192_v29  ;;  %v1561_v40 = vpop.f32.mrf.mxu1  ;;  %v812_v27 = vunpack.c.3.s8 %v799_v17  ;;  %v800_v29 = vld [vmem:[%s1815_s2 + $0x18] sm:$0xff]  ;;  %s1376_s2 = smov [#allocation6]  }
  0xde   :  { %v1188_v32 = vpop.f32.mrf.mxu0  ;;  %v503_v42 = vpack.c.bf16 %v1561_v40, %v1553_v33  ;;  %v1630_v33 = vcvt.s32.f32 %v807_v18  ;;  %v1640_v40 = vcvt.s32.f32 %v804_v25  ;;  %vm843_vm4 = vcmp.gt.f32.partialorder %v1634_v36, 0.0  ;;  %s1044_s17 = sshll.u32 %s1376_s2, 4  ;;  %s1045_s17 = int_to_ptr.vmem [resolvable:$true] %s1044_s17 }
  0xdf   :  { %296 = vst.msk [vmem:[#allocation2 + $0x20] sm:$0xf] %vm287_vm1, %v1129_v31  ;;  %v1132_v34 = vpack.c.bf16 %v1188_v32, %v1188_v32  ;;  %v1566_v44 = vpop.f32.mrf.mxu1  ;;  %v810_v32 = vunpack.c.1.s8 %v799_v17  ;;  %s1352_s4 = scalar_lea.vmem %s1045_s17, 16  ;;  %s1356_s18 = scalar_lea.vmem %s1045_s17, 32 }
  0xe0   :  { %v195_v35 = vpop.f32.mrf.mxu0  ;;  %v1304_v63 = vld [vmem:[#allocation2 + $0x18] sm:$0xff]   ;;  %vm839_vm2 = vcmp.gt.f32.partialorder %v1630_v33, 0.0  ;;  %vm836_vm7 = vcmp.gt.f32.partialorder %v1640_v40, 0.0  ;;  %p1353_p0 = scmp.ne.s32.totalorder %s1045_s17, %s1352_s4  ;;  %p1357_p1 = scmp.lt.s32.totalorder %s1045_s17, %s1045_s17 }
  0xe1   :  { %299 = vst.msk [vmem:[#allocation2 + $0x2c] sm:$0xf] %vm287_vm1, %v1132_v34  ;;  %v1130_v37 = vpack.c.bf16 %v195_v35, %v195_v35  ;;  %v470_v47 = vpop.f32.mrf.mxu1  ;;  %v686_v0 = vsel %vm101_vm0, %v1304_v63, 0  ;;  %v808_v34 = vunpack.c.3.s8 %v798_v15  ;;  %v1632_v35 = vcvt.s32.f32 %v803_v19  ;;  %p1358_p2 = scmp.lt.s32.totalorder %s1356_s18, %s1352_s4 }
  0xe2   :  { %v1191_v39 = vpop.f32.mrf.mxu0  ;;  %v1305_v1 = vld [vmem:[#allocation2 + $0x10] sm:$0xff]  }
  0xe3   :  { %297 = vst.msk [vmem:[#allocation2 + $0x24] sm:$0xf] %vm287_vm1, %v1130_v37  ;;  %v1135_v41 = vpack.c.bf16 %v1191_v39, %v1191_v39  ;;  %v1570_v50 = vpop.f32.mrf.mxu1  ;;  %v683_v2 = vsel %vm101_vm0, %v1305_v1, 0  ;;  %v1636_v37 = vcvt.s32.f32 %v801_v21  ;;  %vm835_vm3 = vcmp.gt.f32.partialorder %v1632_v35, 0.0  ;;  %p1359_p3 = por %p1358_p2, %p1357_p1 }
  0xe4   :  { %v208_v43 = vpop.f32.mrf.mxu0  ;;  %v506_v52 = vpack.c.bf16 %v1570_v50, %v1566_v44  ;;  %v806_v44 = vunpack.c.1.s8 %v798_v15 }
  0xe5   :  { %302 = vst.msk [vmem:[#allocation2 + $0x38] sm:$0xf] %vm287_vm1, %v1135_v41  ;;  %v1133_v45 = vpack.c.bf16 %v208_v43, %v208_v43  ;;  %v473_v53 = vpop.f32.mrf.mxu1  ;;  %v1642_v43 = vcvt.s32.f32 %v805_v26  ;;  %vm833_vm5 = vcmp.gt.f32.partialorder %v1636_v37, 0.0  ;;  %p1360_p4 = pnand %p1359_p3, %p1353_p0 }
  0xe6   :  { %v1192_v46 = vpop.f32.mrf.mxu0  ;;  %v505_v54 = vpack.c.bf16 %v473_v53, %v470_v47  ;;  %v813_v47 = vunpack.c.0.s8 %v800_v29  ;;  %v814_v53 = vunpack.c.1.s8 %v800_v29 }
  0xe7   :  { %300 = vst.msk [vmem:[#allocation2 + $0x30] sm:$0xf] %vm287_vm1, %v1133_v45  ;;  %v1136_v48 = vpack.c.bf16 %v1192_v46, %v1192_v46  ;;  %v1211_v4 = vpop.f32.mrf.mxu1  ;;  %v1644_v45 = vcvt.s32.f32 %v812_v27  ;;  %v1646_v46 = vcvt.s32.f32 %v802_v28  ;;  %vm837_vm8 = vcmp.gt.f32.partialorder %v1642_v43, 0.0 }
  0xe8   :  { %v211_v49 = vpop.f32.mrf.mxu0  ;;  %1237 = vmatprep.mubr.msk.bf16.mxu1 %vm101_vm0, %v505_v54  ;;  %v1302_v59 = vld [vmem:[#allocation2 + $0x28] sm:$0xff]  }
  0xe9   :  { %303 = vst.msk [vmem:[#allocation2 + $0x3c] sm:$0xf] %vm287_vm1, %v1136_v48  ;;  %v1134_v51 = vpack.c.bf16 %v211_v49, %v211_v49  ;;  %v692_v60 = vsel %vm101_vm0, %v1302_v59, 0  ;;  %v486_v7 = vpop.f32.mrf.mxu1  ;;  %v816_v48 = vunpack.c.3.s8 %v800_v29  ;;  %vm844_vm9 = vcmp.gt.f32.partialorder %v1644_v45, 0.0 }
  0xea   :  { %v1303_v61 = vld [vmem:[#allocation2 + $0x20] sm:$0xff]   ;;  %vm834_vm10 = vcmp.gt.f32.partialorder %v1646_v46, 0.0 }
  0xeb   :  { %301 = vst.msk [vmem:[#allocation2 + $0x34] sm:$0xf] %vm287_vm1, %v1134_v51  ;;  %v689_v62 = vsel %vm101_vm0, %v1303_v61, 0  ;;  %v1212_v8 = vpop.f32.mrf.mxu1  ;;  %v1648_v51 = vcvt.s32.f32 %v810_v32 }
  0xec   :  { %v508_v13 = vpack.c.bf16 %v1212_v8, %v1211_v4 }
  0xed   :  { %v489_v10 = vpop.f32.mrf.mxu1  ;;  %vm842_vm11 = vcmp.gt.f32.partialorder %v1648_v51, 0.0 }
  0xee   :  { %v507_v11 = vpack.c.bf16 %v489_v10, %v486_v7 }
  0xf0   :  { %v1300_v55 = vld [vmem:[#allocation2 + $0x38] sm:$0xff]  }
  0xf1   :  { %1261 = vmatprep.subr.msk.bf16.mxu0 %vm101_vm0, %v1300_v55  ;;  %1262 = vmatprep.subr.msk.bf16.mxu1 %vm101_vm0, %v1300_v55  ;;  %v698_v56 = vsel %vm101_vm0, %v1300_v55, 0 }
  0xf2   :  { %v1301_v57 = vld [vmem:[#allocation2 + $0x30] sm:$0xff]   ;;  %1214 = vmatpush3.bf16.xpose.msra.mxu0 %v698_v56  ;;  %1253 = vmatpush3.bf16.xpose.msra.mxu1 %v698_v56 }
  0xf3   :  { %1263 = vmatprep.subr.msk.bf16.mxu0 %vm101_vm0, %v1301_v57  ;;  %1264 = vmatprep.subr.msk.bf16.mxu1 %vm101_vm0, %v1301_v57  ;;  %v695_v58 = vsel %vm101_vm0, %v1301_v57, 0  ;;  %v1661_v57 = vcvt.s32.f32 %v806_v44 }
  0xf5   :  { %vm838_vm14 = vcmp.gt.f32.partialorder %v1661_v57, 0.0 }
  0xfa   :  { %1216 = vmatpush3.bf16.xpose.msra.mxu0 %v695_v58  ;;  %1254 = vmatpush3.bf16.xpose.msra.mxu1 %v695_v58 }
  0xfb   :  { %1265 = vmatprep.subr.msk.bf16.mxu0 %vm101_vm0, %v1302_v59  ;;  %1266 = vmatprep.subr.msk.bf16.mxu1 %vm101_vm0, %v1302_v59  ;;  %v1668_v59 = vcvt.s32.f32 %v813_v47 }
  0xfd   :  { %vm845_vm15 = vcmp.gt.f32.partialorder %v1668_v59, 0.0 }
 0x102   :  { %1218 = vmatpush3.bf16.xpose.msra.mxu0 %v692_v60  ;;  %1255 = vmatpush3.bf16.xpose.msra.mxu1 %v692_v60  ;;  %v1670_v60 = vcvt.s32.f32 %v816_v48 }
 0x103   :  { %1267 = vmatprep.subr.msk.bf16.mxu0 %vm101_vm0, %v1303_v61  ;;  %1268 = vmatprep.subr.msk.bf16.mxu1 %vm101_vm0, %v1303_v61 }
 0x10a   :  { %1220 = vmatpush3.bf16.xpose.msra.mxu0 %v689_v62  ;;  %1256 = vmatpush3.bf16.xpose.msra.mxu1 %v689_v62 }
 0x10b   :  { %1269 = vmatprep.subr.msk.bf16.mxu0 %vm101_vm0, %v1304_v63  ;;  %1270 = vmatprep.subr.msk.bf16.mxu1 %vm101_vm0, %v1304_v63  ;;  %v1675_v63 = vcvt.s32.f32 %v814_v53 }
 0x10d   :  { %vm846_vm1 = vcmp.gt.f32.partialorder %v1675_v63, 0.0 }
 0x112   :  { %1222 = vmatpush3.bf16.xpose.msra.mxu0 %v686_v0  ;;  %1257 = vmatpush3.bf16.xpose.msra.mxu1 %v686_v0 }
 0x113   :  { %1271 = vmatprep.subr.msk.bf16.mxu0 %vm101_vm0, %v1305_v1  ;;  %1272 = vmatprep.subr.msk.bf16.mxu1 %vm101_vm0, %v1305_v1 }
 0x11a   :  { %1224 = vmatpush3.bf16.xpose.msra.mxu0 %v683_v2  ;;  %1258 = vmatpush3.bf16.xpose.msra.mxu1 %v683_v2 }
 0x11b   :  { %1273 = vmatprep.subr.msk.bf16.mxu0 %vm101_vm0, %v1306_v3  ;;  %1274 = vmatprep.subr.msk.bf16.mxu1 %vm101_vm0, %v1306_v3 }
 0x122   :  { %1226 = vmatpush3.bf16.xpose.msra.mxu0 %v680_v5  ;;  %1259 = vmatpush3.bf16.xpose.msra.mxu1 %v680_v5 }
 0x123   :  { %1275 = vmatprep.subr.msk.bf16.mxu0 %vm101_vm0, %v1307_v6  ;;  %1276 = vmatprep.subr.msk.bf16.mxu1 %vm101_vm0, %v1307_v6 }
 0x12a   :  { %1228 = vmatpush3.bf16.xpose.msra.mxu0 %v677_v9  ;;  %1260 = vmatpush3.bf16.xpose.msra.mxu1 %v677_v9 }
 0x131   :  { %1230 = vmatmul.mubr.msk.bf16.vlgmr.msra.gmra.mxu0 %vm101_vm0, %v502_v24  ;;  %1238 = vmatmul.mubr.msk.bf16.vlgmr.msra.gmra.mxu1 %vm101_vm0, %v506_v52  ;;  %v1651_v52 = vcvt.s32.f32 %v808_v34 }
 0x132   :  { %1233 = vmatprep.mubr.msk.bf16.mxu0 %vm101_vm0, %v503_v42  ;;  %1241 = vmatprep.mubr.msk.bf16.mxu1 %vm101_vm0, %v507_v11  ;;  %v815_v42 = vunpack.c.2.s8 %v800_v29 }
 0x133   :  { %vm840_vm12 = vcmp.gt.f32.partialorder %v1651_v52, 0.0 }
 0x134   :  { %v1658_v56 = vcvt.s32.f32 %v815_v42  ;;  %v892_v42 = vlaneseq }
 0x136   :  { %vm847_vm13 = vcmp.gt.f32.partialorder %v1658_v56, 0.0  ;;  %v893_v48 = vshrl.u32 %v892_v42, 7 }
 0x139   :  { %1234 = vmatmul.mubr.msk.bf16.gmra.mxu0 %vm101_vm0, %v504_v38  ;;  %1242 = vmatmul.mubr.msk.bf16.gmra.mxu1 %vm101_vm0, %v508_v13  ;;  %v1638_v38 = vcvt.s32.f32 %v809_v22  ;;  %vm848_vm0 = vcmp.gt.f32.partialorder %v1670_v60, 0.0  ;;  %v986_v60 = vld [vmem:[#allocation5] sm:$0x1] }
 0x13b   :  { %vm841_vm6 = vcmp.gt.f32.partialorder %v1638_v38, 0.0 }
 0x1f1   :  { %v1231_v23 = vpop.f32.mrf.mxu0  ;;  %v1625_v24 = vpop.f32.mrf.mxu1 }
 0x1f2   :  { %v851_v0 = vsel %vm835_vm3, %v1231_v23, -1e+30  ;;  %v1700_v9 = vsel %vm843_vm4, %v1625_v24, -1e+30 }
 0x1f3   :  { %v734_v30 = vpop.f32.mrf.mxu0  ;;  %v766_v31 = vpop.f32.mrf.mxu1 }
 0x1f4   :  { %v849_v1 = vsel %vm833_vm5, %v734_v30, -1e+30  ;;  %v1704_v10 = vsel %vm841_vm6, %v766_v31, -1e+30 }
 0x1f5   :  { %v1232_v39 = vpop.f32.mrf.mxu0  ;;  %v1240_v41 = vpop.f32.mrf.mxu1 }
 0x1f6   :  { %v852_v7 = vsel %vm836_vm7, %v1232_v39, -1e+30  ;;  %v1710_v12 = vsel %vm844_vm9, %v1240_v41, -1e+30 }
 0x1f7   :  { %v737_v49 = vpop.f32.mrf.mxu0  ;;  %v769_v50 = vpop.f32.mrf.mxu1 }
 0x1f8   :  { %v850_v14 = vsel %vm834_vm10, %v737_v49, -1e+30  ;;  %v858_v21 = vsel %vm842_vm11, %v769_v50, -1e+30  ;;  %v1741_v50 = vld [vmem:[#allocation3] sm:$0x1] }
 0x1f9   :  { %v1235_v54 = vpop.f32.mrf.mxu0  ;;  %v1243_v55 = vpop.f32.mrf.mxu1 }
 0x1fa   :  { %v1666_v58 = vsel %vm839_vm2, %v1235_v54, -1e+30  ;;  %v1728_v25 = vsel %vm847_vm13, %v1243_v55, -1e+30  ;;  %v894_v54 = vsub.s32 0, %v893_v48 }
 0x1fb   :  { %v750_v61 = vpop.f32.mrf.mxu0  ;;  %v782_v62 = vpop.f32.mrf.mxu1  ;;  %v868_v3 = vmax.f32 %v851_v0, %v1666_v58 }
 0x1fc   :  { %v1683_v2 = vsel %vm837_vm8, %v750_v61, -1e+30  ;;  %v1732_v26 = vsel %vm845_vm15, %v782_v62, -1e+30 }
 0x1fd   :  { %v866_v4 = vmax.f32 %v849_v1, %v1683_v2  ;;  %v1236_v5 = vpop.f32.mrf.mxu0  ;;  %v1244_v6 = vpop.f32.mrf.mxu1  ;;  %v872_v16 = vmax.f32 %v868_v3, %v1700_v9 }
 0x1fe   :  { %v1694_v8 = vsel %vm840_vm12, %v1236_v5, -1e+30  ;;  %v1723_v22 = vsel %vm848_vm0, %v1244_v6, -1e+30 }
 0x1ff   :  { %v869_v11 = vmax.f32 %v852_v7, %v1694_v8  ;;  %v753_v13 = vpop.f32.mrf.mxu0  ;;  %v870_v17 = vmax.f32 %v866_v4, %v1704_v10  ;;  %v785_v20 = vpop.f32.mrf.mxu1  ;;  %v876_v28 = vmax.f32 %v872_v16, %v1728_v25 }
 0x200   :  { %v854_v15 = vsel %vm838_vm14, %v753_v13, -1e+30  ;;  %v1736_v27 = vsel %vm846_vm1, %v785_v20, -1e+30  ;;  %v556_v20 = vpop.xlane.xlu1 %555 }
 0x201   :  { %v873_v18 = vmax.f32 %v869_v11, %v1710_v12  ;;  %v867_v19 = vmax.f32 %v850_v14, %v854_v15  ;;  %v874_v29 = vmax.f32 %v870_v17, %v1732_v26  ;;  %v550_v17 = vpop.xlane.xlu0 %549 }
 0x203   :  { %v877_v23 = vmax.f32 %v873_v18, %v1723_v22  ;;  %v871_v24 = vmax.f32 %v867_v19, %v858_v21 }
 0x205   :  { %v875_v30 = vmax.f32 %v871_v24, %v1736_v27  ;;  %v879_v31 = vmax.f32 %v876_v28, %v877_v23  ;;  %v553_v23 = vpop.xlane.xlu0 %552 }
 0x207   :  { %v878_v32 = vmax.f32 %v874_v29, %v875_v30 }
 0x209   :  { %v880_v34 = vmax.f32 %v878_v32, %v879_v31  ;;  %v562_v31 = vpop.xlane.xlu0 %561 }
 0x20b   :  { %v881_v39 = vrot.slane %v880_v34, 4 }
 0x20d   :  { %v882_v41 = vmax.f32 %v880_v34, %v881_v39 }
 0x20f   :  { %v883_v44 = vrot.slane %v882_v41, 2 }
 0x211   :  { %v884_v47 = vmax.f32 %v882_v41, %v883_v44 }
 0x213   :  { %v885_v49 = vrot.slane %v884_v47, 1 }
 0x215   :  { %v886_v53 = vmax.f32 %v884_v47, %v885_v49 }
 0x217   :  { %v1744_v55 = vmax.f32 %v1741_v50, %v886_v53 }
 0x219   :  { %v1747_v61 = vrot.slane %v1744_v55, %v894_v54  ;;  %1027 = vst [vmem:[#allocation3] sm:$0x1] %v1744_v55  ;;  %v568_v54 = vpop.xlane.xlu0 %567  ;;  %v888_v38 = vsub.f32 %v1741_v50, %v1744_v55 }
 0x21b   :  { %v899_v62 = vsub.f32 %v851_v0, %v1747_v61  ;;  %v897_v3 = vsub.f32 %v849_v1, %v1747_v61  ;;  %v900_v4 = vsub.f32 %v852_v7, %v1747_v61  ;;  %v898_v5 = vsub.f32 %v850_v14, %v1747_v61 }
 0x21c   :  { %v901_v13 = vsub.f32 %v1683_v2, %v1747_v61  ;;  %v902_v19 = vsub.f32 %v854_v15, %v1747_v61  ;;  %v903_v1 = vsub.f32 %v1666_v58, %v1747_v61  ;;  %v904_v14 = vsub.f32 %v1694_v8, %v1747_v61  ;;  %v559_v15 = vpop.xlane.xlu1 %558 }
 0x21d   :  { %v917_v6 = vmul.f32 1.442695, %v899_v62  ;;  %v913_v11 = vmul.f32 1.442695, %v897_v3  ;;  %v919_v16 = vmul.f32 1.442695, %v900_v4  ;;  %v905_v24 = vsub.f32 %v1704_v10, %v1747_v61 }
 0x21e   :  { %v915_v18 = vmul.f32 1.442695, %v898_v5  ;;  %v921_v0 = vmul.f32 1.442695, %v901_v13  ;;  %v923_v7 = vmul.f32 1.442695, %v902_v19  ;;  %v906_v29 = vsub.f32 %v858_v21, %v1747_v61 }
 0x21f   :  { %1316 = vpow2.f32 %v917_v6  ;;  %v925_v2 = vmul.f32 1.442695, %v903_v1  ;;  %v927_v28 = vmul.f32 1.442695, %v904_v14  ;;  %v929_v30 = vmul.f32 1.442695, %v905_v24 }
 0x220   :  { %1318 = vpow2.f32 %v913_v11  ;;  %v907_v58 = vsub.f32 %v1700_v9, %v1747_v61  ;;  %v931_v32 = vmul.f32 1.442695, %v906_v29  ;;  %v908_v8 = vsub.f32 %v1710_v12, %v1747_v61  ;;  %v565_v39 = vpop.xlane.xlu1 %564 }
 0x221   :  { %1320 = vpow2.f32 %v919_v16  ;;  %v909_v41 = vsub.f32 %v1732_v26, %v1747_v61  ;;  %v910_v44 = vsub.f32 %v1736_v27, %v1747_v61  ;;  %v911_v12 = vsub.f32 %v1728_v25, %v1747_v61 }
 0x222   :  { %1322 = vpow2.f32 %v915_v18  ;;  %v933_v10 = vmul.f32 1.442695, %v907_v58  ;;  %v935_v47 = vmul.f32 1.442695, %v908_v8  ;;  %v912_v25 = vsub.f32 %v1723_v22, %v1747_v61 }
 0x223   :  { %1324 = vpow2.f32 %v921_v0  ;;  %v937_v62 = vmul.f32 1.442695, %v909_v41  ;;  %v939_v4 = vmul.f32 1.442695, %v910_v44 }
 0x224   :  { %1326 = vpow2.f32 %v923_v7  ;;  %v571_v6 = vpop.xlane.xlu1 %570  ;;  %v574_v7 = vpop.xlane.xlu0 %573  ;;  %v943_v14 = vmul.f32 1.442695, %v912_v25 }
 0x225   :  { %1328 = vpow2.f32 %v925_v2 }
 0x226   :  { %1330 = vpow2.f32 %v927_v28 }
 0x227   :  { %1332 = vpow2.f32 %v929_v30 }
 0x228   :  { %1334 = vpow2.f32 %v931_v32  ;;  %v577_v2 = vpop.xlane.xlu1 %576 }
 0x229   :  { %1336 = vpow2.f32 %v933_v10 }
 0x22a   :  { %1338 = vpow2.f32 %v935_v47 }
 0x22b   :  { %1340 = vpow2.f32 %v937_v62 }
 0x22c   :  { %v1317_v34 = vpop.eup %1316  ;;  %1342 = vpow2.f32 %v939_v4 }
 0x22d   :  { %v1319_v42 = vpop.eup %1318  ;;  %v947_v53 = vsel %vm835_vm3, %v1317_v34, 0.0  ;;  %v580_v34 = vpop.xlane.xlu0 %579 }
 0x22e   :  { %v1321_v21 = vpop.eup %1320  ;;  %v945_v9 = vsel %vm833_vm5, %v1319_v42, 0.0  ;;  %v990_v11 = vmul.f32 %v947_v53, %v556_v20 }
 0x22f   :  { %v1323_v48 = vpop.eup %1322  ;;  %v988_v49 = vmul.f32 %v945_v9, %v550_v17  ;;  %v948_v5 = vsel %vm836_vm7, %v1321_v21, 0.0  ;;  %v941_v17 = vmul.f32 1.442695, %v911_v12  ;;  %v583_v21 = vpop.xlane.xlu1 %582 }
 0x230   :  { %v946_v26 = vsel %vm834_vm10, %v1323_v48, 0.0  ;;  %v1325_v27 = vpop.eup %1324  ;;  %v991_v19 = vmul.f32 %v948_v5, %v559_v15 }
 0x231   :  { %v963_v3 = vadd.f32 %v946_v26, %v945_v9  ;;  %v989_v37 = vmul.f32 %v946_v26, %v553_v23  ;;  %v1327_v35 = vpop.eup %1326  ;;  %v949_v16 = vsel %vm837_vm8, %v1325_v27, 0.0  ;;  %1344 = vpow2.f32 %v941_v17  ;;  %v586_v51 = vpop.xlane.xlu0 %585 }
 0x232   :  { %v1329_v18 = vpop.eup %1328  ;;  %v950_v40 = vsel %vm838_vm14, %v1327_v35, 0.0  ;;  %v992_v20 = vmul.f32 %v949_v16, %v562_v31  ;;  %1346 = vpow2.f32 %v943_v14 }
 0x233   :  { %v964_v13 = vadd.f32 %v963_v3, %v947_v53  ;;  %v1004_v46 = vadd.f32 %v989_v37, %v988_v49  ;;  %v1331_v22 = vpop.eup %1330  ;;  %v951_v43 = vsel %vm839_vm2, %v1329_v18, 0.0  ;;  %v993_v28 = vmul.f32 %v950_v40, %v565_v39  ;;  %v589_v4 = vpop.xlane.xlu1 %588 }
 0x234   :  { %v1333_v24 = vpop.eup %1332  ;;  %v952_v30 = vsel %vm840_vm12, %v1331_v22, 0.0  ;;  %v994_v32 = vmul.f32 %v951_v43, %v568_v54 }
 0x235   :  { %v1005_v0 = vadd.f32 %v1004_v46, %v990_v11  ;;  %v965_v1 = vadd.f32 %v964_v13, %v948_v5  ;;  %v1335_v57 = vpop.eup %1334  ;;  %v953_v31 = vsel %vm841_vm6, %v1333_v24, 0.0  ;;  %v995_v10 = vmul.f32 %v952_v30, %v571_v6 }
 0x236   :  { %v1337_v33 = vpop.eup %1336  ;;  %v954_v39 = vsel %vm842_vm11, %v1335_v57, 0.0  ;;  %v996_v9 = vmul.f32 %v953_v31, %v574_v7  ;;  %v889_v6 = vmul.f32 1.442695, %v888_v38 }
 0x237   :  { %v966_v61 = vadd.f32 %v965_v1, %v949_v16  ;;  %v1006_v23 = vadd.f32 %v1005_v0, %v991_v19  ;;  %v1339_v44 = vpop.eup %1338  ;;  %v955_v48 = vsel %vm843_vm4, %v1337_v33, 0.0  ;;  %v997_v12 = vmul.f32 %v954_v39, %v577_v2  ;;  %v592_v16 = vpop.xlane.xlu0 %591 }
 0x238   :  { %v1341_v49 = vpop.eup %1340  ;;  %v956_v54 = vsel %vm844_vm9, %v1339_v44, 0.0  ;;  %v998_v3 = vmul.f32 %v955_v48, %v580_v34  ;;  %1348 = vpow2.f32 %v889_v6  ;;  %v595_v0 = vpop.xlane.xlu1 %594 }
 0x239   :  { %v1007_v15 = vadd.f32 %v1006_v23, %v992_v20  ;;  %v967_v29 = vadd.f32 %v966_v61, %v950_v40  ;;  %v1343_v62 = vpop.eup %1342  ;;  %v957_v36 = vsel %vm845_vm15, %v1341_v49, 0.0  ;;  %v999_v25 = vmul.f32 %v956_v54, %v583_v21 }
 0x23a   :  { %v958_v55 = vsel %vm846_vm1, %v1343_v62, 0.0  ;;  %v1000_v13 = vmul.f32 %v957_v36, %v586_v51 }
 0x23b   :  { %v968_v58 = vadd.f32 %v967_v29, %v951_v43  ;;  %v1008_v8 = vadd.f32 %v1007_v15, %v993_v28  ;;  %v1001_v18 = vmul.f32 %v958_v55, %v589_v4 }
 0x23d   :  { %v1009_v41 = vadd.f32 %v1008_v8, %v994_v32  ;;  %v969_v42 = vadd.f32 %v968_v58, %v952_v30  ;;  %v961_v30 = vld [vmem:[#allocation4] sm:$0x1] }
 0x23e   :  { %v1345_v5 = vpop.eup %1344 }
 0x23f   :  { %v970_v52 = vadd.f32 %v969_v42, %v953_v31  ;;  %v1010_v47 = vadd.f32 %v1009_v41, %v995_v10  ;;  %v1347_v11 = vpop.eup %1346  ;;  %v959_v17 = vsel %vm847_vm13, %v1345_v5, 0.0 }
 0x240   :  { %v960_v1 = vsel %vm848_vm0, %v1347_v11, 0.0  ;;  %v1002_v7 = vmul.f32 %v959_v17, %v592_v16 }
 0x241   :  { %v1011_v53 = vadd.f32 %v1010_v47, %v996_v9  ;;  %v971_v26 = vadd.f32 %v970_v52, %v954_v39  ;;  %v1003_v14 = vmul.f32 %v960_v1, %v595_v0 }
 0x243   :  { %v972_v27 = vadd.f32 %v971_v26, %v955_v48  ;;  %v1012_v37 = vadd.f32 %v1011_v53, %v997_v12 }
 0x245   :  { %v1013_v35 = vadd.f32 %v1012_v37, %v998_v3  ;;  %v973_v50 = vadd.f32 %v972_v27, %v956_v54  ;;  %v1349_v29 = vpop.eup %1348 }
 0x246   :  { %v962_v32 = vmul.f32 %v1349_v29, %v961_v30  ;;  %v987_v33 = vmul.f32 %v1349_v29, %v986_v60 }
 0x247   :  { %v974_v45 = vadd.f32 %v973_v50, %v957_v36  ;;  %v1014_v46 = vadd.f32 %v1013_v35, %v999_v25 }
 0x249   :  { %v1015_v59 = vadd.f32 %v1014_v46, %v1000_v13  ;;  %v975_v19 = vadd.f32 %v974_v45, %v958_v55 }
 0x24b   :  { %v976_v40 = vadd.f32 %v975_v19, %v959_v17  ;;  %v1016_v63 = vadd.f32 %v1015_v59, %v1001_v18 }
 0x24d   :  { %v977_v22 = vadd.f32 %v976_v40, %v960_v1  ;;  %v1017_v61 = vadd.f32 %v1016_v63, %v1002_v7 }
 0x24f   :  { %v978_v20 = vrot.slane %v977_v22, 4  ;;  %v1018_v23 = vadd.f32 %v1017_v61, %v1003_v14 }
 0x251   :  { %v979_v43 = vadd.f32 %v978_v20, %v977_v22  ;;  %v1019_v2 = vrot.slane %v1018_v23, 4 }
 0x253   :  { %v980_v56 = vrot.slane %v979_v43, 2  ;;  %v1020_v24 = vadd.f32 %v1019_v2, %v1018_v23 }
 0x255   :  { %v981_v28 = vadd.f32 %v980_v56, %v979_v43  ;;  %v1021_v15 = vrot.slane %v1020_v24, 2 }
 0x257   :  { %v982_v57 = vrot.slane %v981_v28, 1  ;;  %v1022_v58 = vadd.f32 %v1021_v15, %v1020_v24 }
 0x259   :  { %v983_v8 = vadd.f32 %v982_v57, %v981_v28  ;;  %v1023_v31 = vrot.slane %v1022_v58, 1 }
 0x25b   :  { %v984_v34 = vadd.f32 %v983_v8, %v962_v32  ;;  %v1024_v10 = vadd.f32 %v1023_v31, %v1022_v58 }
 0x25d   :  { %985 = vst [vmem:[#allocation4] sm:$0x1] %v984_v34  ;;  %v1025_v41 = vadd.f32 %v1024_v10, %v987_v33 }
 0x25f   :  { %1026 = vst [vmem:[#allocation5] sm:$0x1] %v1025_v41 }
 0x264   :  { %v1031_v42 = vld [vmem:[#allocation4] sm:$0x1] }
 0x265   :  { %vm1032_vm2 = vcmp.gt.f32.partialorder %v1031_v42, 0.0 }
 0x266   :  { %v1033_v39 = vsel %vm1032_vm2, %v1031_v42, 1.0  ;;  %v1034_v44 = vld [vmem:[#allocation5] sm:$0x1] }
 0x267   :  { %1350 = vrcp.f32 %v1033_v39 }
 0x274   :  { %v1351_v21 = vpop.eup %1350 }
 0x275   :  { %v1036_v52 = vmul.f32 %v1351_v21, %v1034_v44 }
 0x277   :  { %1037 = vst [vmem:[#allocation6] sm:$0x1] %v1036_v52 }
 0x278   :  { %1363 = shalt.err (!%p1360_p4)
}
 0x279   :  { %1047 = dma.vmem_to_hbm [thread:$0]  %s1045_s17, 16, %s1819_s6, [#allocation7]  }
 0x27a   :  { %1372 = dma.done.wait [#allocation7], 16  }
 0x27b   :  { %1373 = vsyncadd [#allocation7], 4294967280 }
 0x27c   :  { %1051 = vsyncpa [#allocation7], 1 }

</bundles_post_ra>
